<compile_context>
chip_gen: v6e
topology: v6e:2x2x1
jax: 0.10.0
libtpu: 0.0.40
codegen_flags: <defaults>
</compile_context>

<pallas_src>
import functools
import math

import jax
import jax.numpy as jnp
from jax import lax
from jax.experimental import pallas as pl
from jax.experimental.pallas import tpu as pltpu

_HI = jax.lax.Precision.HIGHEST
_EPS = 1e-6
_SLOPE = 0.2


# ---------------------------------------------------------------------------
# One-time probe: pin down pltpu.roll's direction convention so the in-kernel
# shifted conv taps can never silently mirror.  We require jnp.roll semantics
# (out[..., p] == in[..., p - shift]); if the backend convention differs we
# compensate with (n - shift).
# ---------------------------------------------------------------------------
_ROLL_MATCHES_JNP = None


def _roll_matches_jnp():
    global _ROLL_MATCHES_JNP
    if _ROLL_MATCHES_JNP is None:
        def kernel(x_ref, o_ref):
            o_ref[...] = pltpu.roll(x_ref[...], 1, axis=1)

        x = jnp.broadcast_to(jnp.arange(128, dtype=jnp.int32), (8, 128))
        out = pl.pallas_call(
            kernel, out_shape=jax.ShapeDtypeStruct((8, 128), jnp.int32))(x)
        _ROLL_MATCHES_JNP = bool(int(out[0, 0]) == 127)
    return _ROLL_MATCHES_JNP


# ---------------------------------------------------------------------------
# Tiny plain-JAX glue (kept in XLA deliberately, see header TODOs).
# ---------------------------------------------------------------------------
def _leaky(v):
    return jnp.where(v >= 0, v, _SLOPE * v)


def _bilinear_up2(x):
    """nn.Upsample(scale_factor=2, mode='bilinear', align_corners=False)."""
    def up_axis(a, axis):
        n = a.shape[axis]
        first = lax.slice_in_dim(a, 0, 1, axis=axis)
        last = lax.slice_in_dim(a, n - 1, n, axis=axis)
        prev = jnp.concatenate([first, lax.slice_in_dim(a, 0, n - 1, axis=axis)], axis=axis)
        nxt = jnp.concatenate([lax.slice_in_dim(a, 1, n, axis=axis), last], axis=axis)
        even = 0.25 * prev + 0.75 * a
        odd = 0.75 * a + 0.25 * nxt
        inter = jnp.stack([even, odd], axis=axis + 1)
        shp = list(a.shape)
        shp[axis] = 2 * n
        return inter.reshape(shp)

    return up_axis(up_axis(x, 2), 3)


def _reflect_pad1(x):
    return jnp.pad(x, ((0, 0), (0, 0), (1, 1), (1, 1)), mode="reflect")


def _taps_block_diag(conv_w, inc, outc, groups):
    """(Cout, Cin/g, k, k) grouped conv weight -> (k*k, Cout, Cin) dense taps."""
    cout_g = outc // groups
    cin_g = inc // groups
    k = conv_w.shape[-1]
    full = jnp.zeros((outc, inc, k, k), jnp.float32)
    for g in range(groups):
        full = full.at[g * cout_g:(g + 1) * cout_g,
                       g * cin_g:(g + 1) * cin_g].set(
            conv_w[g * cout_g:(g + 1) * cout_g].astype(jnp.float32))
    return jnp.transpose(full, (2, 3, 0, 1)).reshape(k * k, outc, inc)


# ---------------------------------------------------------------------------
# The fused Pallas kernel (one grid step = one batch element).
# ---------------------------------------------------------------------------
def _fused_kernel(rho_ref, w1_ref, w2_ref, b2_ref, g1_ref, b1_ref,
                  gr_ref, br_ref, xup_ref, rgbup_ref,
                  x_out_ref, rgb_out_ref, *, h, w, outc, scale, roll_std):
    hw = h * w
    lane = lax.broadcasted_iota(jnp.int32, (1, hw), 1)
    rr = lane // w
    cc = lane % w
    row_first = rr == 0
    row_last = rr == h - 1
    col_first = cc == 0
    col_last = cc == w - 1

    def shift(v, k):
        # out[..., p] = v[..., p - k]  (jnp.roll semantics).  Wrapped lanes are
        # overwritten by the reflection fix below, so wraparound is harmless.
        n = v.shape[-1]
        k = k % n
        if k == 0:
            return v
        if not roll_std:
            k = n - k
        return pltpu.roll(v, k, axis=v.ndim - 1)

    def tap(v, sy, sx):
        # v[refl(i + sy), refl(j + sx)] with ReflectionPad2d(1) semantics,
        # on the lane-flat (C, h*w) image.
        out = v
        if sy != 0:
            main = shift(out, -sy * w)
            alt = shift(out, sy * w)
            out = jnp.where(row_first if sy < 0 else row_last, alt, main)
        if sx != 0:
            main = shift(out, -sx)
            alt = shift(out, sx)
            out = jnp.where(col_first if sx < 0 else col_last, alt, main)
        return out

    def conv3x3(v, taps_ref, cout):
        rows = {sy: tap(v, sy, 0) for sy in (-1, 0, 1)}
        acc = jnp.zeros((cout, hw), jnp.float32)
        t = 0
        for sy in (-1, 0, 1):
            for sx in (-1, 0, 1):
                sh = tap(rows[sy], 0, sx)
                acc = acc + jnp.dot(taps_ref[t], sh, precision=_HI,
                                    preferred_element_type=jnp.float32)
                t += 1
        return acc

    def adalin(v, c, gamma, beta, rho):
        ins_mean = jnp.mean(v, axis=1, keepdims=True)                 # (c, 1)
        d = v - ins_mean
        ins_var = jnp.sum(d * d, axis=1, keepdims=True) * (1.0 / (hw - 1))
        x_ins = d * lax.rsqrt(ins_var + _EPS)
        ln_mean = jnp.mean(ins_mean, axis=0, keepdims=True)           # (1, 1)
        dl = v - ln_mean
        ln_var = jnp.sum(jnp.sum(dl * dl, axis=1, keepdims=True),
                         axis=0, keepdims=True) * (1.0 / (c * hw - 1))
        x_ln = dl * lax.rsqrt(ln_var + _EPS)
        y = rho * x_ins + (1.0 - rho) * x_ln
        return y * gamma + beta

    # ---- main path: x branch ------------------------------------------------
    xin = xup_ref[0].astype(jnp.float32)                              # (inc, hw)
    xc = conv3x3(xin, w1_ref, outc)                                   # scale folded into w1
    y1 = adalin(xc, outc, g1_ref[0], b1_ref[0], rho_ref[0])
    x_act = jnp.where(y1 >= 0.0, y1, _SLOPE * y1)
    x_out_ref[0] = x_act.astype(x_out_ref.dtype)

    # ---- rgb branch (conv2rgb + AdaLIN_rgb + upsampled-rgb add) -------------
    xr = conv3x3(x_act, w2_ref, 3) + b2_ref[...]                      # (3, hw)
    ttt = adalin(xr, 3, gr_ref[0], br_ref[0], rho_ref[1])
    rgb_out_ref[0] = (rgbup_ref[0].astype(jnp.float32)
                      + ttt * scale).astype(rgb_out_ref.dtype)


# ---------------------------------------------------------------------------
# UpsampleBlock3 forward (Pallas path).
# ---------------------------------------------------------------------------
def upsample_block3_forward(params, x, z, rgb):
    b, inc, h, w = x.shape
    outc = params["conv_w"].shape[0]
    groups = params["groups"]
    assert params["stride"] == 1, "fused kernel covers the stride=1 configuration"
    scale = float(params["scale"])
    h_up, w_up = 2 * h, 2 * w
    hw = h_up * w_up
    f32 = jnp.float32

    # --- tiny XLA-side glue (all << 1 MB) ------------------------------------
    xup = _bilinear_up2(x).reshape(b, inc, hw)
    rgbup = _bilinear_up2(rgb).reshape(b, 3, hw)

    z1 = _leaky(jnp.dot(z, params["fc_w"].T, precision=_HI) + params["fc_b"])
    z_rgb = _leaky(jnp.dot(z, params["rgb_fc_w"].T, precision=_HI) + params["rgb_fc_b"])
    pa, pr = params["adalin"], params["rgb_adalin"]
    g1 = (jnp.dot(z1, pa["gamma_w"].T, precision=_HI) + pa["gamma_b"]).reshape(b, outc, 1)
    b1 = (jnp.dot(z1, pa["beta_w"].T, precision=_HI) + pa["beta_b"]).reshape(b, outc, 1)
    gr = (jnp.dot(z_rgb, pr["gamma_w"].T, precision=_HI) + pr["gamma_b"]).reshape(b, 3, 1)
    br = (jnp.dot(z_rgb, pr["beta_w"].T, precision=_HI) + pr["beta_b"]).reshape(b, 3, 1)

    # rho stays a traced scalar (learned parameter) -> SMEM, clamped like torch.
    rhos = jnp.concatenate([
        jnp.clip(jnp.asarray(pa["rho"], f32).reshape(-1)[:1] - 0.1, 0.0, 1.0),
        jnp.clip(jnp.asarray(pr["rho"], f32).reshape(-1)[:1] - 0.1, 0.0, 1.0),
    ]).astype(f32)

    # Per-tap conv weights: groups folded block-diagonally, conv1 scale folded in.
    w1_taps = _taps_block_diag(params["conv_w"], inc, outc, groups) * scale
    w2_taps = jnp.transpose(params["conv2rgb_w"].astype(f32),
                            (2, 3, 0, 1)).reshape(9, 3, outc)
    b2 = params["conv2rgb_b"].reshape(3, 1).astype(f32)

    kernel = functools.partial(
        _fused_kernel, h=h_up, w=w_up, outc=outc, scale=scale,
        roll_std=_roll_matches_jnp())

    x_out, rgb_out = pl.pallas_call(
        kernel,
        out_shape=(jax.ShapeDtypeStruct((b, outc, hw), x.dtype),
                   jax.ShapeDtypeStruct((b, 3, hw), rgb.dtype)),
        grid=(b,),
        in_specs=[
            pl.BlockSpec(memory_space=pltpu.MemorySpace.SMEM),        # rhos (2,)
            pl.BlockSpec((9, outc, inc), lambda i: (0, 0, 0)),        # conv1 taps
            pl.BlockSpec((9, 3, outc), lambda i: (0, 0, 0)),          # conv2rgb taps
            pl.BlockSpec((3, 1), lambda i: (0, 0)),                   # conv2rgb bias
            pl.BlockSpec((1, outc, 1), lambda i: (i, 0, 0)),          # gamma1
            pl.BlockSpec((1, outc, 1), lambda i: (i, 0, 0)),          # beta1
            pl.BlockSpec((1, 3, 1), lambda i: (i, 0, 0)),             # gamma_rgb
            pl.BlockSpec((1, 3, 1), lambda i: (i, 0, 0)),             # beta_rgb
            pl.BlockSpec((1, inc, hw), lambda i: (i, 0, 0)),          # upsampled x
            pl.BlockSpec((1, 3, hw), lambda i: (i, 0, 0)),            # upsampled rgb
        ],
        out_specs=(pl.BlockSpec((1, outc, hw), lambda i: (i, 0, 0)),
                   pl.BlockSpec((1, 3, hw), lambda i: (i, 0, 0))),
        compiler_params=pltpu.CompilerParams(
            dimension_semantics=("parallel",)),
    )(rhos, w1_taps, w2_taps, b2, g1.astype(f32), b1.astype(f32),
      gr.astype(f32), br.astype(f32), xup, rgbup)

    return (x_out.reshape(b, outc, h_up, w_up),
            rgb_out.reshape(b, 3, h_up, w_up))


# ---------------------------------------------------------------------------
# Pure-JAX reference (matches the PyTorch forward).
# ---------------------------------------------------------------------------
def _adalin_ref(x, zz, p):
    b, c = x.shape[:2]
    xr = x.reshape(b, c, -1)
    ins_mean = xr.mean(axis=2).reshape(b, c, 1, 1)
    ins_var = jnp.var(xr, axis=2, ddof=1).reshape(b, c, 1, 1) + _EPS
    x_ins = (x - ins_mean) / jnp.sqrt(ins_var)
    xf = x.reshape(b, -1)
    ln_mean = xf.mean(axis=1).reshape(b, 1, 1, 1)
    ln_var = jnp.var(xf, axis=1, ddof=1).reshape(b, 1, 1, 1) + _EPS
    x_ln = (x - ln_mean) / jnp.sqrt(ln_var)
    rho = jnp.clip(p["rho"] - 0.1, 0.0, 1.0)
    x_hat = rho * x_ins + (1 - rho) * x_ln
    gamma = (jnp.dot(zz, p["gamma_w"].T, precision=_HI) + p["gamma_b"]).reshape(b, c, 1, 1)
    beta = (jnp.dot(zz, p["beta_w"].T, precision=_HI) + p["beta_b"]).reshape(b, c, 1, 1)
    return x_hat * gamma + beta


def _ref_forward(params, x, z, rgb):
    scale = params["scale"]
    s = params["stride"]
    g = params["groups"]
    dn = ("NCHW", "OIHW", "NCHW")

    xu = _reflect_pad1(_bilinear_up2(x))
    xc = lax.conv_general_dilated(xu, params["conv_w"], (s, s), "VALID",
                                  dimension_numbers=dn, feature_group_count=g,
                                  precision=_HI) * scale
    z1 = _leaky(jnp.dot(z, params["fc_w"].T, precision=_HI) + params["fc_b"])
    x1 = _leaky(_adalin_ref(xc, z1, params["adalin"]))

    z_rgb = _leaky(jnp.dot(z, params["rgb_fc_w"].T, precision=_HI) + params["rgb_fc_b"])
    xrc = lax.conv_general_dilated(_reflect_pad1(x1), params["conv2rgb_w"], (s, s),
                                   "VALID", dimension_numbers=dn,
                                   feature_group_count=1, precision=_HI)
    xrc = xrc + params["conv2rgb_b"].reshape(1, -1, 1, 1)
    ttt = _adalin_ref(xrc, z_rgb, params["rgb_adalin"])
    rgb_out = _bilinear_up2(rgb) + ttt * scale
    return x1, rgb_out


if __name__ == "__main__":
    inc, outc, k, s, group = 4, 4, 3, 1, 1
    bsz, h, w, z_dim = 2, 16, 16, 512

    key = jax.random.PRNGKey(0)
    ks = jax.random.split(key, 14)
    x = jax.random.normal(ks[0], (bsz, inc, h, w), jnp.float32)
    z = jax.random.normal(ks[1], (bsz, z_dim), jnp.float32)
    rgb = jax.random.normal(ks[2], (bsz, 3, h, w), jnp.float32)

    params = {
        "scale": 1.0 / math.sqrt(inc * 3 ** 2),
        "stride": s,
        "groups": group,
        "conv_w": 0.2 * jax.random.normal(ks[3], (outc, inc // group, k, k), jnp.float32),
        "fc_w": 0.05 * jax.random.normal(ks[4], (outc, z_dim), jnp.float32),
        "fc_b": 0.1 * jax.random.normal(ks[5], (outc,), jnp.float32),
        "rgb_fc_w": 0.05 * jax.random.normal(ks[6], (3, z_dim), jnp.float32),
        "rgb_fc_b": 0.1 * jax.random.normal(ks[7], (3,), jnp.float32),
        "conv2rgb_w": 0.2 * jax.random.normal(ks[8], (3, outc, k, k), jnp.float32),
        "conv2rgb_b": 0.1 * jax.random.normal(ks[9], (3,), jnp.float32),
        "adalin": {
            "rho": jnp.ones((1,), jnp.float32),
            "gamma_w": 0.3 * jax.random.normal(ks[10], (outc, outc), jnp.float32),
            "gamma_b": jnp.ones((outc,), jnp.float32),
            "beta_w": 0.3 * jax.random.normal(ks[11], (outc, outc), jnp.float32),
            "beta_b": jnp.zeros((outc,), jnp.float32),
        },
        "rgb_adalin": {
            "rho": jnp.ones((1,), jnp.float32),
            "gamma_w": 0.3 * jax.random.normal(ks[12], (3, 3), jnp.float32),
            "gamma_b": jnp.ones((3,), jnp.float32),
            "beta_w": 0.3 * jax.random.normal(ks[13], (3, 3), jnp.float32),
            "beta_b": jnp.zeros((3,), jnp.float32),
        },
    }

    x_out, rgb_out = upsample_block3_forward(params, x, z, rgb)
    x_out, rgb_out = jax.block_until_ready((x_out, rgb_out))

    x_ref, rgb_ref = _ref_forward(params, x, z, rgb)

    assert x_out.shape == (bsz, outc, 2 * h, 2 * w) and x_out.dtype == x.dtype
    assert rgb_out.shape == (bsz, 3, 2 * h, 2 * w) and rgb_out.dtype == rgb.dtype
    assert jnp.allclose(x_out, x_ref, atol=5e-3, rtol=5e-3), "x mismatch vs reference"
    assert jnp.allclose(rgb_out, rgb_ref, atol=5e-3, rtol=5e-3), "rgb mismatch vs reference"

    print("KERNEL_OK")
</pallas_src>

<mosaic_0001>
module attributes {stable_mosaic.version = 11 : i64} {
  func.func @kernel(%arg0: memref<8x128xi32, #tpu.memory_space<vmem>>, %arg1: memref<8x128xi32, #tpu.memory_space<vmem>>) attributes {dimension_semantics = [], scalar_prefetch = 0 : i64, scratch_operands = 0 : i64, tpu.core_type = #tpu.core_type<tc>} {
    %c0 = arith.constant 0 : index
    %c0_0 = arith.constant 0 : index
    %0 = vector.load %arg0[%c0, %c0_0] : memref<8x128xi32, #tpu.memory_space<vmem>>, vector<8x128xi32>
    %c1_i32 = arith.constant 1 : i32
    %1 = tpu.dynamic_rotate %0 by %c1_i32 dim 1 : vector<8x128xi32>, i32 -> vector<8x128xi32>
    %c0_1 = arith.constant 0 : index
    %c0_2 = arith.constant 0 : index
    %2 = vector.load %arg1[%c0_1, %c0_2] : memref<8x128xi32, #tpu.memory_space<vmem>>, vector<8x128xi32>
    tpu.vector_store %arg1[%c0_1, %c0_2], %1 {strides = array<i32>} : memref<8x128xi32, #tpu.memory_space<vmem>>, vector<8x128xi32>,
    return
  }
}

</mosaic_0001>

<bundles_post_ra>
// kernel: tpu_custom_call.1
= control target key start
LH: loop header
LB: loop body
LE: loop exit
PB: predicated region body
PF: predicated region fallthrough
CT: control target
= control target key end

     0   :  { %6 = vsyncpa [#allocation3], 0  ;;  %s106_s0 = inlined_call_operand.hbm [shape: s32[8,128], index: 0, kind: input, shape index: {}]   ;;  %s107_s1 = inlined_call_operand.hbm [shape: s32[8,128], index: 1, kind: output, shape index: {}]  }
   0x1   :  { %7 = vsyncpa [#allocation4], 0  ;;  %s87_s6 = smov [#allocation2]  }
   0x2   :  { %s14_s7 = sshll.u32 %s87_s6, 4  ;;  %s15_s7 = int_to_ptr.vmem [resolvable:$true] %s14_s7 }
   0x3   :  { %s51_s8 = scalar_lea.vmem %s15_s7, 128  ;;  %p56_p1 = scmp.lt.s32.totalorder %s15_s7, %s15_s7 }
   0x4   :  { %p52_p0 = scmp.ne.s32.totalorder %s15_s7, %s51_s8  ;;  %p57_p2 = scmp.lt.s32.totalorder %s51_s8, %s51_s8 }
   0x6   :  { %p58_p3 = por %p57_p2, %p56_p1 }
   0x8   :  { %p59_p4 = pnand %p58_p3, %p52_p0 }
   0xa   :  { %62 = shalt.err (!%p59_p4)
}
   0xb   :  { %17 = dma.hbm_to_vmem [thread:$0]  %s106_s0, 128, %s15_s7, [#allocation3]  }
   0xc   :  { %83 = dma.done.wait [#allocation3], 128  }
   0xd   :  { %84 = vsyncadd [#allocation3], 4294967168  ;;  %v21_v0 = vld [vmem:[#allocation2] sm:$0xff]  ;;  %s88_s11 = smov 1   ;;  %s89_s12 = smov [#allocation5]  }
   0xe   :  { %22 = vrot.lane.b32.xlu0 %v21_v0, %s88_s11  ;;  %s31_s13 = sshll.u32 %s89_s12, 4  ;;  %s32_s13 = int_to_ptr.vmem [resolvable:$true] %s31_s13 }
   0xf   :  { %s63_s14 = scalar_lea.vmem %s32_s13, 128  ;;  %p68_p6 = scmp.lt.s32.totalorder %s32_s13, %s32_s13 }
  0x10   :  { %p64_p5 = scmp.ne.s32.totalorder %s32_s13, %s63_s14  ;;  %p69_p7 = scmp.lt.s32.totalorder %s63_s14, %s63_s14 }
  0x12   :  { %p70_p8 = por %p69_p7, %p68_p6 }
  0x14   :  { %p71_p9 = pnand %p70_p8, %p64_p5 }
  0x80   :  { %v23_v1 = vpop.permute.xlu0 %22 }
  0x81   :  { %24 = vst [vmem:[#allocation5] sm:$0xff] %v23_v1 }
  0x82   :  { %74 = shalt.err (!%p71_p9)
}
  0x83   :  { %34 = dma.vmem_to_hbm [thread:$0]  %s32_s13, 128, %s107_s1, [#allocation4]  }
  0x84   :  { %85 = dma.done.wait [#allocation4], 128  }
  0x85   :  { %86 = vsyncadd [#allocation4], 4294967168 }
  0x86   :  { %38 = vsyncpa [#allocation3], 1 }
  0x87   :  { %39 = vsyncpa [#allocation4], 1 }

</bundles_post_ra>
